<compile_context>
chip_gen: v7x
topology: tpu7x:2x2x1
jax: 0.10.0
libtpu: 0.0.40
codegen_flags: <defaults>
</compile_context>

<pallas_src>
import functools

import jax
import jax.numpy as jnp
from jax.experimental import pallas as pl
from jax.experimental.pallas import tpu as pltpu


# ----------------------------------------------------------------------------- padding glue
def bound_pad_nchw(x, padding):
    """JAX port of bound_pad. padding = (left, right, top, bottom), NCHW input."""
    left, right, top, bottom = padding
    n, c, _, w = x.shape
    # top: constant pad with global mean of the first row (matches float(input[:, :, 0, :].mean()))
    top_val = jnp.mean(x[:, :, 0, :])
    x = jnp.concatenate([jnp.full((n, c, top, w), top_val, x.dtype), x], axis=2)
    # bottom: constant pad with global mean of the (current) last row
    bot_val = jnp.mean(x[:, :, -1, :])
    x = jnp.concatenate([x, jnp.full((n, c, bottom, w), bot_val, x.dtype)], axis=2)
    # left/right: circular pad along width
    x = jnp.concatenate([x[:, :, :, w - left:], x, x[:, :, :, :right]], axis=3)
    return x


def zero_pad_nchw(x, padding):
    left, right, top, bottom = padding
    return jnp.pad(x, ((0, 0), (0, 0), (top, bottom), (left, right)))


# ----------------------------------------------------------------------------- weight prep
def _toeplitz_conv_weight(w_kkio, Wo, Wp, Cin, Cout, K):
    """Banded-Toeplitz conv weight.

    Returns (K, Wp*Cin, Wo*Cout) with
      W_t[kh, (j+kw)*Cin + c, j*Cout + o] = w_kkio[kh, kw, c, o]
    so that   acc = sum_kh  xm_rows[kh:kh+Ho, :] @ W_t[kh]   is the dense 2D conv.
    """
    eye = jnp.eye(Wo, dtype=jnp.float32)
    bands = []
    for kh in range(K):
        acc = jnp.zeros((Wp * Cin, Wo * Cout), jnp.float32)
        for kw in range(K):
            # blk[j*Cin+c, j*Cout+o] = w[kh, kw, c, o]   (block diagonal over j)
            blk = jnp.einsum('jk,co->jcko', eye, w_kkio[kh, kw]).reshape(Wo * Cin, Wo * Cout)
            acc = acc + jnp.pad(blk, ((kw * Cin, (Wp - Wo - kw) * Cin), (0, 0)))
        bands.append(acc)
    return jnp.stack(bands, axis=0)


def _toeplitz_mask_weight(Wo, Wp, Cin, Cout, K):
    """Ones-Toeplitz for the all-ones mask_conv: (Wp*Cin, Wo*Cout).

    T[(j+kw)*Cin + c, j*Cout + o] = 1, so  msum = (sum_kh m_rows[kh:kh+Ho, :]) @ T
    equals the K*K*Cin window sum of the padded mask, replicated across Cout.
    """
    eye = jnp.eye(Wo, dtype=jnp.float32)
    ones_co = jnp.ones((Cin, Cout), jnp.float32)
    acc = jnp.zeros((Wp * Cin, Wo * Cout), jnp.float32)
    for kw in range(K):
        blk = jnp.einsum('jk,co->jcko', eye, ones_co).reshape(Wo * Cin, Wo * Cout)
        acc = acc + jnp.pad(blk, ((kw * Cin, (Wp - Wo - kw) * Cin), (0, 0)))
    return acc


# ----------------------------------------------------------------------------- Pallas kernel
def _pconv_kernel(x_ref, m_ref, wt_ref, t_ref, b_ref, out_ref, nm_ref, *, K, Ho):
    # x_ref/m_ref: (1, Hp, Wp*Cin) padded input / mask (one batch element, row-flattened)
    # wt_ref: (K, Wp*Cin, Wo*Cout) banded-Toeplitz conv weight
    # t_ref:  (Wp*Cin, Wo*Cout) ones-Toeplitz (mask_conv)
    # b_ref:  (1, Wo*Cout) bias tiled across the Wo positions
    x = x_ref[0]                       # (Hp, Wp*Cin)
    m = m_ref[0]                       # (Hp, Wp*Cin)
    xm = x * m                         # pad_input * pad_mask (wide vregs)
    b = b_ref[...]                     # (1, Wo*Cout)

    wp_cin = x.shape[1]
    wo_cout = out_ref.shape[2]

    acc = jnp.zeros((Ho, wo_cout), jnp.float32)      # raw conv (no bias) == output - bias
    mband = jnp.zeros((Ho, wp_cin), jnp.float32)     # sum over kh of shifted mask rows
    for kh in range(K):                              # 3 MXU dots, contiguous sublane slices
        acc = acc + jnp.dot(xm[kh:kh + Ho, :], wt_ref[kh],
                            preferred_element_type=jnp.float32)
        mband = mband + m[kh:kh + Ho, :]
    msum = jnp.dot(mband, t_ref[...], preferred_element_type=jnp.float32)  # (Ho, Wo*Cout)

    holes = msum == 0.0
    msum_safe = jnp.where(holes, 1.0, msum)
    inv = pl.reciprocal(msum_safe, approx=True)      # EUP slot, ~free

    # output_pre = (output - bias) / mask_sum + bias ; then hole fill, then ReLU
    out = jnp.where(holes, 0.0, acc * inv + b)
    out = jnp.maximum(out, 0.0)                      # activation = ReLU
    new_mask = jnp.where(holes, 0.0, 1.0)

    out_ref[0] = out.astype(out_ref.dtype)           # lane-dense (Ho, 128) unmasked stores
    nm_ref[0] = new_mask.astype(nm_ref.dtype)


# ----------------------------------------------------------------------------- wrapper
def pconv_block(input_nchw, mask_nchw, weight_oikk, bias_o, *,
                padding=(1, 1, 1, 1), global_padding=True):
    N, Cin, H, W = input_nchw.shape
    Cout, Cin_w, K, K2 = weight_oikk.shape
    assert Cin_w == Cin and K == K2

    pad_fn = bound_pad_nchw if global_padding else zero_pad_nchw
    xp = pad_fn(input_nchw.astype(jnp.float32), padding)
    mp = pad_fn(mask_nchw.astype(jnp.float32), padding)
    Hp, Wp = xp.shape[2], xp.shape[3]
    Ho, Wo = Hp - K + 1, Wp - K + 1           # stride = 1, dilation = 1

    # NHWC then flatten (Wp, Cin) -> row-major (Wp*Cin) rows: lane-dense-ish kernel layout
    x_flat = jnp.transpose(xp, (0, 2, 3, 1)).reshape(N, Hp, Wp * Cin)
    m_flat = jnp.transpose(mp, (0, 2, 3, 1)).reshape(N, Hp, Wp * Cin)

    w_kkio = jnp.transpose(weight_oikk, (2, 3, 1, 0)).astype(jnp.float32)   # (K,K,Cin,Cout)
    wt = _toeplitz_conv_weight(w_kkio, Wo, Wp, Cin, Cout, K)                # (K, Wp*Cin, Wo*Cout)
    t_ones = _toeplitz_mask_weight(Wo, Wp, Cin, Cout, K)                    # (Wp*Cin, Wo*Cout)
    b_tiled = jnp.tile(bias_o.astype(jnp.float32).reshape(1, Cout), (1, Wo))  # (1, Wo*Cout)

    kernel = functools.partial(_pconv_kernel, K=K, Ho=Ho)

    out_flat, nm_flat = pl.pallas_call(
        kernel,
        out_shape=(jax.ShapeDtypeStruct((N, Ho, Wo * Cout), jnp.float32),
                   jax.ShapeDtypeStruct((N, Ho, Wo * Cout), jnp.float32)),
        grid_spec=pltpu.PrefetchScalarGridSpec(
            num_scalar_prefetch=0,
            grid=(N,),
            in_specs=[
                pl.BlockSpec((1, Hp, Wp * Cin), lambda n: (n, 0, 0)),
                pl.BlockSpec((1, Hp, Wp * Cin), lambda n: (n, 0, 0)),
                pl.BlockSpec((K, Wp * Cin, Wo * Cout), lambda n: (0, 0, 0)),
                pl.BlockSpec((Wp * Cin, Wo * Cout), lambda n: (0, 0)),
                pl.BlockSpec((1, Wo * Cout), lambda n: (0, 0)),
            ],
            out_specs=[
                pl.BlockSpec((1, Ho, Wo * Cout), lambda n: (n, 0, 0)),
                pl.BlockSpec((1, Ho, Wo * Cout), lambda n: (n, 0, 0)),
            ],
        ),
        compiler_params=pltpu.CompilerParams(dimension_semantics=("parallel",)),
    )(x_flat, m_flat, wt, t_ones, b_tiled)

    # back to NCHW (PyTorch convention)
    out = jnp.transpose(out_flat.reshape(N, Ho, Wo, Cout), (0, 3, 1, 2))
    new_mask = jnp.transpose(nm_flat.reshape(N, Ho, Wo, Cout), (0, 3, 1, 2))
    return out, new_mask


if __name__ == "__main__":
    key = jax.random.PRNGKey(0)
    k_x, k_m, k_w, k_b = jax.random.split(key, 4)

    N, Cin, H, W = 2, 4, 16, 16
    Cout, K = 8, 3

    x = jax.random.normal(k_x, (N, Cin, H, W), dtype=jnp.float32)
    mask = (jax.random.uniform(k_m, (N, Cin, H, W)) > 0.3).astype(jnp.float32)

    # deterministic parameter init (shapes match nn.Conv2d(in, out, 3, 1, 0, 1, 1, bias=True))
    weight = 0.1 * jax.random.normal(k_w, (Cout, Cin, K, K), dtype=jnp.float32)
    bias = 0.1 * jax.random.normal(k_b, (Cout,), dtype=jnp.float32)

    out, new_mask = pconv_block(x, mask, weight, bias,
                                padding=(1, 1, 1, 1), global_padding=True)
    jax.block_until_ready((out, new_mask))

    assert out.shape == (N, Cout, H, W)
    assert new_mask.shape == (N, Cout, H, W)
    print("KERNEL_OK")
</pallas_src>

<mosaic_0001>
module attributes {stable_mosaic.version = 11 : i64} {
  func.func @_pconv_kernel(%arg0: i32, %arg1: memref<1x18x72xf32, #tpu.memory_space<vmem>>, %arg2: memref<1x18x72xf32, #tpu.memory_space<vmem>>, %arg3: memref<3x72x128xf32, #tpu.memory_space<vmem>>, %arg4: memref<72x128xf32, #tpu.memory_space<vmem>>, %arg5: memref<1x128xf32, #tpu.memory_space<vmem>>, %arg6: memref<1x16x128xf32, #tpu.memory_space<vmem>>, %arg7: memref<1x16x128xf32, #tpu.memory_space<vmem>>) attributes {dimension_semantics = [#tpu.dimension_semantics<parallel>], iteration_bounds = array<i64: 2>, scalar_prefetch = 0 : i64, scratch_operands = 0 : i64, tpu.core_type = #tpu.core_type<tc>, window_params = [{transform_indices = @transform_0, window_bounds = array<i64: 1, 18, 72>}, {transform_indices = @transform_1, window_bounds = array<i64: 1, 18, 72>}, {pipeline_mode = #tpu.pipeline_mode<synchronous>, transform_indices = @transform_2, window_bounds = array<i64: 3, 72, 128>}, {pipeline_mode = #tpu.pipeline_mode<synchronous>, transform_indices = @transform_3, window_bounds = array<i64: 72, 128>}, {pipeline_mode = #tpu.pipeline_mode<synchronous>, transform_indices = @transform_4, window_bounds = array<i64: 1, 128>}, {transform_indices = @transform_5, window_bounds = array<i64: 1, 16, 128>}, {transform_indices = @transform_6, window_bounds = array<i64: 1, 16, 128>}]} {
    %c0 = arith.constant 0 : index
    %c0_0 = arith.constant 0 : index
    %c0_1 = arith.constant 0 : index
    %0 = vector.load %arg1[%c0, %c0_0, %c0_1] : memref<1x18x72xf32, #tpu.memory_space<vmem>>, vector<1x18x72xf32>
    %1 = vector.shape_cast %0 : vector<1x18x72xf32> to vector<18x72xf32>
    %c0_2 = arith.constant 0 : index
    %c0_3 = arith.constant 0 : index
    %c0_4 = arith.constant 0 : index
    %2 = vector.load %arg2[%c0_2, %c0_3, %c0_4] : memref<1x18x72xf32, #tpu.memory_space<vmem>>, vector<1x18x72xf32>
    %3 = vector.shape_cast %2 : vector<1x18x72xf32> to vector<18x72xf32>
    %4 = arith.mulf %1, %3 : vector<18x72xf32>
    %c0_5 = arith.constant 0 : index
    %c0_6 = arith.constant 0 : index
    %5 = vector.load %arg5[%c0_5, %c0_6] : memref<1x128xf32, #tpu.memory_space<vmem>>, vector<1x128xf32>
    %cst = arith.constant 0.000000e+00 : f32
    %6 = vector.broadcast %cst : f32 to vector<16x128xf32>
    %cst_7 = arith.constant 0.000000e+00 : f32
    %7 = vector.broadcast %cst_7 : f32 to vector<16x72xf32>
    %8 = vector.extract_strided_slice %4 {offsets = [0, 0], sizes = [16, 72], strides = [1, 1]} : vector<18x72xf32> to vector<16x72xf32>
    %c0_8 = arith.constant 0 : index
    %c0_9 = arith.constant 0 : index
    %c0_10 = arith.constant 0 : index
    %9 = vector.load %arg3[%c0_8, %c0_9, %c0_10] : memref<3x72x128xf32, #tpu.memory_space<vmem>>, vector<1x72x128xf32>
    %10 = vector.shape_cast %9 : vector<1x72x128xf32> to vector<72x128xf32>
    %cst_11 = arith.constant dense<0.000000e+00> : vector<16x128xf32>
    %11 = tpu.matmul %8, %10, %cst_11 {dimension_numbers = #tpu.dot_dimension_numbers<[1], [0], [0], [1], [0, 0, 1, 1], [], []>} : vector<16x72xf32>, vector<72x128xf32>, vector<16x128xf32> -> vector<16x128xf32>
    %12 = arith.addf %6, %11 : vector<16x128xf32>
    %13 = vector.extract_strided_slice %3 {offsets = [0, 0], sizes = [16, 72], strides = [1, 1]} : vector<18x72xf32> to vector<16x72xf32>
    %14 = arith.addf %7, %13 : vector<16x72xf32>
    %15 = vector.extract_strided_slice %4 {offsets = [1, 0], sizes = [16, 72], strides = [1, 1]} : vector<18x72xf32> to vector<16x72xf32>
    %c1 = arith.constant 1 : index
    %c0_12 = arith.constant 0 : index
    %c0_13 = arith.constant 0 : index
    %16 = vector.load %arg3[%c1, %c0_12, %c0_13] : memref<3x72x128xf32, #tpu.memory_space<vmem>>, vector<1x72x128xf32>
    %17 = vector.shape_cast %16 : vector<1x72x128xf32> to vector<72x128xf32>
    %cst_14 = arith.constant dense<0.000000e+00> : vector<16x128xf32>
    %18 = tpu.matmul %15, %17, %cst_14 {dimension_numbers = #tpu.dot_dimension_numbers<[1], [0], [0], [1], [0, 0, 1, 1], [], []>} : vector<16x72xf32>, vector<72x128xf32>, vector<16x128xf32> -> vector<16x128xf32>
    %19 = arith.addf %12, %18 : vector<16x128xf32>
    %20 = vector.extract_strided_slice %3 {offsets = [1, 0], sizes = [16, 72], strides = [1, 1]} : vector<18x72xf32> to vector<16x72xf32>
    %21 = arith.addf %14, %20 : vector<16x72xf32>
    %22 = vector.extract_strided_slice %4 {offsets = [2, 0], sizes = [16, 72], strides = [1, 1]} : vector<18x72xf32> to vector<16x72xf32>
    %c2 = arith.constant 2 : index
    %c0_15 = arith.constant 0 : index
    %c0_16 = arith.constant 0 : index
    %23 = vector.load %arg3[%c2, %c0_15, %c0_16] : memref<3x72x128xf32, #tpu.memory_space<vmem>>, vector<1x72x128xf32>
    %24 = vector.shape_cast %23 : vector<1x72x128xf32> to vector<72x128xf32>
    %cst_17 = arith.constant dense<0.000000e+00> : vector<16x128xf32>
    %25 = tpu.matmul %22, %24, %cst_17 {dimension_numbers = #tpu.dot_dimension_numbers<[1], [0], [0], [1], [0, 0, 1, 1], [], []>} : vector<16x72xf32>, vector<72x128xf32>, vector<16x128xf32> -> vector<16x128xf32>
    %26 = arith.addf %19, %25 : vector<16x128xf32>
    %27 = vector.extract_strided_slice %3 {offsets = [2, 0], sizes = [16, 72], strides = [1, 1]} : vector<18x72xf32> to vector<16x72xf32>
    %28 = arith.addf %21, %27 : vector<16x72xf32>
    %c0_18 = arith.constant 0 : index
    %c0_19 = arith.constant 0 : index
    %29 = vector.load %arg4[%c0_18, %c0_19] : memref<72x128xf32, #tpu.memory_space<vmem>>, vector<72x128xf32>
    %cst_20 = arith.constant dense<0.000000e+00> : vector<16x128xf32>
    %30 = tpu.matmul %28, %29, %cst_20 {dimension_numbers = #tpu.dot_dimension_numbers<[1], [0], [0], [1], [0, 0, 1, 1], [], []>} : vector<16x72xf32>, vector<72x128xf32>, vector<16x128xf32> -> vector<16x128xf32>
    %cst_21 = arith.constant 0.000000e+00 : f32
    %31 = vector.broadcast %cst_21 : f32 to vector<16x128xf32>
    %32 = arith.cmpf oeq, %30, %31 : vector<16x128xf32>
    %cst_22 = arith.constant 1.000000e+00 : f32
    %33 = vector.broadcast %cst_22 : f32 to vector<16x128xf32>
    %34 = arith.select %32, %33, %30 : vector<16x128xi1>, vector<16x128xf32>
    %35 = tpu.reciprocal %34 {approx = true} : vector<16x128xf32> -> vector<16x128xf32>
    %36 = arith.mulf %26, %35 : vector<16x128xf32>
    %37 = vector.broadcast %5 : vector<1x128xf32> to vector<16x128xf32>
    %38 = arith.addf %36, %37 : vector<16x128xf32>
    %cst_23 = arith.constant 0.000000e+00 : f32
    %39 = vector.broadcast %cst_23 : f32 to vector<16x128xf32>
    %40 = arith.select %32, %39, %38 : vector<16x128xi1>, vector<16x128xf32>
    %cst_24 = arith.constant 0.000000e+00 : f32
    %41 = vector.broadcast %cst_24 : f32 to vector<16x128xf32>
    %42 = arith.maximumf %40, %41 : vector<16x128xf32>
    %cst_25 = arith.constant 0.000000e+00 : f32
    %cst_26 = arith.constant 1.000000e+00 : f32
    %43 = vector.broadcast %cst_25 : f32 to vector<16x128xf32>
    %44 = vector.broadcast %cst_26 : f32 to vector<16x128xf32>
    %45 = arith.select %32, %43, %44 : vector<16x128xi1>, vector<16x128xf32>
    %c0_27 = arith.constant 0 : index
    %c0_28 = arith.constant 0 : index
    %c0_29 = arith.constant 0 : index
    %46 = vector.load %arg6[%c0_27, %c0_28, %c0_29] : memref<1x16x128xf32, #tpu.memory_space<vmem>>, vector<1x16x128xf32>
    %47 = vector.shape_cast %46 : vector<1x16x128xf32> to vector<16x128xf32>
    %48 = vector.shape_cast %42 : vector<16x128xf32> to vector<1x16x128xf32>
    tpu.vector_store %arg6[%c0_27, %c0_28, %c0_29], %48 {strides = array<i32>} : memref<1x16x128xf32, #tpu.memory_space<vmem>>, vector<1x16x128xf32>,
    %c0_30 = arith.constant 0 : index
    %c0_31 = arith.constant 0 : index
    %c0_32 = arith.constant 0 : index
    %49 = vector.load %arg7[%c0_30, %c0_31, %c0_32] : memref<1x16x128xf32, #tpu.memory_space<vmem>>, vector<1x16x128xf32>
    %50 = vector.shape_cast %49 : vector<1x16x128xf32> to vector<16x128xf32>
    %51 = vector.shape_cast %45 : vector<16x128xf32> to vector<1x16x128xf32>
    tpu.vector_store %arg7[%c0_30, %c0_31, %c0_32], %51 {strides = array<i32>} : memref<1x16x128xf32, #tpu.memory_space<vmem>>, vector<1x16x128xf32>,
    return
  }
  func.func @transform_0(%arg0: i32) -> (i32, i32, i32) {
    %c0_i32 = arith.constant 0 : i32
    %c0_i32_0 = arith.constant 0 : i32
    %c0_i32_1 = arith.constant 0 : i32
    return %arg0, %c0_i32, %c0_i32_0 : i32, i32, i32
  }
  func.func @transform_1(%arg0: i32) -> (i32, i32, i32) {
    %c0_i32 = arith.constant 0 : i32
    %c0_i32_0 = arith.constant 0 : i32
    %c0_i32_1 = arith.constant 0 : i32
    return %arg0, %c0_i32, %c0_i32_0 : i32, i32, i32
  }
  func.func @transform_2(%arg0: i32) -> (i32, i32, i32) {
    %c0_i32 = arith.constant 0 : i32
    %c0_i32_0 = arith.constant 0 : i32
    %c0_i32_1 = arith.constant 0 : i32
    %c0_i32_2 = arith.constant 0 : i32
    return %c0_i32, %c0_i32_0, %c0_i32_1 : i32, i32, i32
  }
  func.func @transform_3(%arg0: i32) -> (i32, i32) {
    %c0_i32 = arith.constant 0 : i32
    %c0_i32_0 = arith.constant 0 : i32
    %c0_i32_1 = arith.constant 0 : i32
    return %c0_i32, %c0_i32_0 : i32, i32
  }
  func.func @transform_4(%arg0: i32) -> (i32, i32) {
    %c0_i32 = arith.constant 0 : i32
    %c0_i32_0 = arith.constant 0 : i32
    %c0_i32_1 = arith.constant 0 : i32
    return %c0_i32, %c0_i32_0 : i32, i32
  }
  func.func @transform_5(%arg0: i32) -> (i32, i32, i32) {
    %c0_i32 = arith.constant 0 : i32
    %c0_i32_0 = arith.constant 0 : i32
    %c0_i32_1 = arith.constant 0 : i32
    return %arg0, %c0_i32, %c0_i32_0 : i32, i32, i32
  }
  func.func @transform_6(%arg0: i32) -> (i32, i32, i32) {
    %c0_i32 = arith.constant 0 : i32
    %c0_i32_0 = arith.constant 0 : i32
    %c0_i32_1 = arith.constant 0 : i32
    return %arg0, %c0_i32, %c0_i32_0 : i32, i32, i32
  }
}

</mosaic_0001>

<bundles_post_ra>
// kernel: tpu_custom_call.1
= control target key start
LH: loop header
LB: loop body
LE: loop exit
PB: predicated region body
PF: predicated region fallthrough
CT: control target
= control target key end

     0   :  { %12 = vsyncpa [#allocation3], 0  ;;  %s1608_s0 = inlined_call_operand.vmem [shape: f32[2,18,72], index: 0, kind: input, shape index: {}]   ;;  %s1609_s1 = inlined_call_operand.vmem [shape: f32[2,18,72], index: 1, kind: input, shape index: {}]   ;;  %s1610_s2 = inlined_call_operand.hbm [shape: f32[3,72,128], index: 2, kind: input, shape index: {}]   ;;  %s1611_s3 = inlined_call_operand.vmem [shape: f32[72,128], index: 3, kind: input, shape index: {}]   ;;  %s1612_s4 = inlined_call_operand.vmem [shape: f32[1,128], index: 4, kind: input, shape index: {}]   ;;  %s1613_s5 = inlined_call_operand.hbm [shape: f32[2,16,128], index: 5, kind: output, shape index: {0}]   ;;  %s1614_s6 = inlined_call_operand.hbm [shape: f32[2,16,128], index: 6, kind: output, shape index: {1}]  }
   0x1   :  { %13 = vsyncpa [#allocation4], 0 }
   0x2   :  { %15 = vsyncpa [#allocation4 + $0x1], 0 }
   0x3   :  { %16 = vsyncpa [#allocation7], 0 }
   0x4   :  { %18 = vsyncpa [#allocation7 + $0x1], 0  ;;  %s1343_s21 = smov 0   ;;  %s1345_s22 = smov 0  }
   0x5   :  { %s1347_s23 = smov 0   ;;  %s1349_s24 = smov 0  }
   0x6 LB: > { %s1364_s25 = sadd.s32 4294967295, %s1298_s24   ;;  %s882_s26 = sadd.s32 4294967294, %s1298_s24   ;;  %s1298_s24 = sphi %s1349_s24, %s1630_s24   ;;  %s1294_s23 = sphi %s1347_s23, %s1629_s23   ;;  %s1290_s22 = sphi %s1345_s22, %s1628_s22   ;;  %s1286_s21 = sphi %s1343_s21, %s1627_s21  }
   0x7   : > { %s1368_s27 = sadd.s32 1, %s1298_s24   ;;  %s146_s28 = sadd.s32 1, %s1294_s23 }
   0x8   : > { %s143_s29 = ssub.s32 %s1298_s24, %s1368_s27  ;;  %p156_p0 = scmp.ne.s32.totalorder %s1294_s23, %s1290_s22 }
   0x9   : > { %p144_p1 = scmp.eq.s32.totalorder %s143_s29, 0  ;;  %p157_p2 = scmp.eq.s32.totalorder %s1364_s25, 1 }
   0xa   : > { %p162_p3 = scmp.ne.s32.totalorder %s1290_s22, %s1286_s21  ;;  %p163_p4 = scmp.eq.s32.totalorder %s882_s26, 1 }
   0xb   : > { %s1379_s30 = scalar_select %p144_p1, %s1294_s23, %s146_s28  }
   0xc   : > { %p1381_p5 = por %p157_p2, %p156_p0  ;;  %p1385_p6 = por %p163_p4, %p162_p3 }
   0xd   : > { %p883_p7 = scmp.ge.s32.totalorder %s1298_s24, 1  ;;  %p196_p8 = scmp.lt.s32.totalorder %s1298_s24, 3 }
   0xe   : > { %s1618_s7 = scalar_select %p1381_p5, 1, 0 }
   0xf   : > { %s1619_s8 = scalar_select %p1385_p6, 1, 0 }
  0x10   : > { %p1615_p9 = scmp.eq.s32.totalorder %s1364_s25, 0  ;;  %p1392_p10 = pnand %p883_p7, %p196_p8 }
  0x11   : > { %s1300_s10 = smov [#allocation2]   ;;  %s1172_s15 = scalar_lea.hbm %s1610_s2, 3456 }
  0x12   : > { %s1620_s9 = scalar_select %p1392_p10, 1, 0 }
  0x13   : > { %s208_s11 = sshll.u32 %s1300_s10, 4  ;;  %p1116_p11 = pneg %p1392_p10  ;;  %s209_s11 = int_to_ptr.vmem [resolvable:$true] %s208_s11 }
  0x14   : > { %p1173_p13 = scmp.ne.s32.totalorder %s1610_s2, %s1172_s15  ;;  %p1179_p3 = scmp.lt.u32.totalorder %s1172_s15, %s1610_s2 }
  0x15   : > { %p1400_p12 = pnand %p1615_p9, %p1116_p11 }
  0x17   : > { %p1174_p0 = pneg %p1400_p12 }
  0x19   : > { %p1175_p1 = pnand %p1174_p0, %p1173_p13 }
  0x1b   : > { %p1176_p2 = pneg %p1175_p1 }
  0x1d   : > { %p1181_p4 = pnand %p1179_p3, %p1176_p2 }
  0x1f   : > { %1184 = shalt.err (!%p1181_p4)
}
  0x20   : > { %s1185_s20 = scalar_lea.vmem %s209_s11, 3456  ;;  %p1193_p9 = scmp.lt.s32.totalorder %s209_s11, %s209_s11 }
  0x21   : > { %p1186_p7 = scmp.ne.s32.totalorder %s209_s11, %s1185_s20  ;;  %p1194_p6 = scmp.lt.s32.totalorder %s1185_s20, %s1185_s20 }
  0x23   : > { %p1188_p8 = pnand %p1186_p7, %p1174_p0  ;;  %p1195_p5 = por %p1194_p6, %p1193_p9 }
  0x25   : > { %p1189_p11 = pneg %p1188_p8 }
  0x27   : > { %p1196_p10 = pnand %p1195_p5, %p1189_p11 }
  0x29   : > { %1199 = shalt.err (!%p1196_p10)
}
  0x2a   : > { %s1301_s26 = smov 128   ;;  %s1302_s28 = smov 8  }
  0x2b   : > { %1119 = dma.hbm_to_vmem [thread:$0]  (!%p1400_p12), %s1610_s2, 3456, %s209_s11, [#allocation3], %s1301_s26, %s1301_s26, %s1302_s28  }
  0x2c   : > { %p1622_p13 = scmp.ne.s32.totalorder %s1620_s9, 0 }
  0x2d   : > { %p1623_p1 = scmp.eq.s32.totalorder (!%p1622_p13), %s1364_s25, 0 }
  0x2e   : > { %246 = sbr.rel (%p1622_p13) target bundleno = 348 (0x15c), region = 40 }
  0x35   : > { %1273 = dma.done.wait (%p1623_p1), [#allocation3], 3456   ;;  %p1624_p0 = pmov %p1623_p1 }
  0x36   : > { %p286_p5 = scmp.lt.s32.totalorder %s1364_s25, 1  ;;  %v318_v0 = vld [vmem:[#allocation2 + $0x48] sm:$0xff]  ;;  %v319_v1 = vld [vmem:[#allocation2 + $0x50] sm:$0xff]  ;;  %v306_v2 = vld [vmem:[#allocation2] sm:$0xff]  ;;  %vm336_vm0 = vcmask 588800   ;;  %vm330_vm1 = vcmask 1046528  }
  0x37   : > { %1275 = vsyncadd (%p1624_p0), [#allocation3], 4294963840  ;;  %v1039_v3 = vpack.c.bf16 %v319_v1, %v318_v0  ;;  %v307_v4 = vld [vmem:[#allocation2 + $0x8] sm:$0xff]  ;;  %v320_v5 = vld [vmem:[#allocation2 + $0x58] sm:$0xff]  ;;  %vm517_vm2 = vcmask 1045504   ;;  %s1502_s26 = sand.u32 1, %s1290_s22  }
  0x38   : > { %s287_s13 = scalar_select %p286_p5, %s1364_s25, 1  ;;  %v321_v6 = vld [vmem:[#allocation2 + $0x60] sm:$0xff]  ;;  %v1055_v7 = vpack.c.bf16 %v307_v4, %v306_v2  ;;  %v308_v9 = vld [vmem:[#allocation2 + $0x10] sm:$0xff]  ;;  %v309_v10 = vld [vmem:[#allocation2 + $0x18] sm:$0xff] }
  0x39   : > { %v1043_v8 = vpack.c.bf16 %v321_v6, %v320_v5  ;;  %v322_v11 = vld [vmem:[#allocation2 + $0x68] sm:$0xff]  ;;  %1040 = vmatprep.subr.bf16.mxu1 %v1039_v3  ;;  %v1059_v12 = vpack.c.bf16 %v309_v10, %v308_v9  ;;  %v323_v13 = vld [vmem:[#allocation2 + $0x70] sm:$0xff]  ;;  %v310_v14 = vld [vmem:[#allocation2 + $0x20] sm:$0xff]  ;;  %s888_s28 = sshll.u32 %s1502_s26, 4  ;;  %p1625_p9 = scmp.ne.s32.totalorder %s1618_s7, 0 }
  0x3a   : > { %s1107_s14 = smul.u32 24, %s287_s13  ;;  %v311_v15 = vld [vmem:[#allocation2 + $0x28] sm:$0xff]  ;;  %1056 = vmatprep.subr.bf16.mxu0 %v1055_v7  ;;  %1042 = vmatpush3.bf16.msra.mxu1 %v1039_v3  ;;  %v324_v16 = vld [vmem:[#allocation2 + $0x78] sm:$0xff]  ;;  %v1047_v17 = vpack.c.bf16 %v323_v13, %v322_v11  ;;  %v325_v18 = vld [vmem:[#allocation2 + $0x80] sm:$0xff]  ;;  %s285_s29 = scalar_lea.vmem [#allocation6], %s888_s28 }
  0x3b   : > { %1058 = vmatpush3.bf16.msra.mxu0 %v1055_v7  ;;  %1044 = vmatprep.subr.bf16.mxu1 %v1043_v8  ;;  %v312_v19 = vld [vmem:[#allocation2 + $0x30] sm:$0xff]  ;;  %v313_v20 = vld [vmem:[#allocation2 + $0x38] sm:$0xff]  ;;  %v1063_v21 = vpack.c.bf16 %v311_v15, %v310_v14  ;;  %v1051_v30 = vpack.c.bf16 %v325_v18, %v324_v16  ;;  %v326_v38 = vld [vmem:[#allocation2 + $0x88] sm:$0xff]  ;;  %s764_s10 = sshll.u32 %s285_s29, 4  ;;  %s909_s13 = sshll.u32 %s1364_s25, 8  ;;  %s1508_s10 = int_to_ptr.vmem [resolvable:$true] %s764_s10 }
  0x3c   : > { %s290_s12 = scalar_lea.vmem %s1608_s0, %s1107_s14  ;;  %s295_s17 = scalar_lea.vmem %s1609_s1, %s1107_s14  ;;  %1060 = vmatprep.subr.bf16.mxu0 %v1059_v12  ;;  %v1067_v32 = vpack.c.bf16 %v313_v20, %v312_v19  ;;  %v508_v40 = vld [vmem:[#allocation2 + $0x90] sm:$0xff]  ;;  %v509_v41 = vld [vmem:[#allocation2 + $0x98] sm:$0xff]  ;;  %v314_v42 = vld [vmem:[#allocation2 + $0x40] sm:$0xff] }
  0x3d   : > { %v296_v22 = vld [vmem:[%s290_s12] sm:$0xff]  ;;  %v297_v23 = vld [vmem:[%s290_s12 + $0x8] sm:$0xff]  ;;  %v1436_v26 = vld [vmem:[%s295_s17 + $0x10] sm:$0x3]  ;;  %v1071_v48 = vpack.c.bf16 %v509_v41, %v508_v40  ;;  %s1517_s11 = scalar_lea.hbm %s1614_s6, %s909_s13  ;;  %s1200_s15 = scalar_lea.vmem %s1508_s10, 256 }
  0x3e   : > { %v299_v24 = vld [vmem:[%s295_s17] sm:$0xff]  ;;  %v1434_v25 = vld [vmem:[%s295_s17 + $0x8] sm:$0xff]  ;;  %v298_v28 = vld [vmem:[%s290_s12 + $0x10] sm:$0x3]  ;;  %1046 = vmatpush3.bf16.msra.mxu1 %v1043_v8  ;;  %v501_v4 = vrot.slane %v1436_v26, 1  ;;  %v607_v13 = vrot.slane %v1436_v26, 2  ;;  %p1201_p6 = scmp.ne.s32.totalorder %s1508_s10, %s1200_s15 }
  0x3f   : > { %v302_v27 = vmul.f32 %v299_v24, %v296_v22  ;;  %v1439_v29 = vmul.f32 %v1434_v25, %v297_v23  ;;  %1062 = vmatpush3.bf16.msra.mxu0 %v1059_v12  ;;  %1048 = vmatprep.subr.bf16.mxu1 %v1047_v17  ;;  %v1443_v34 = vmul.f32 %v1436_v26, %v298_v28  ;;  %v498_v35 = vrot.slane %v299_v24, 1  ;;  %v613_v44 = vld [vmem:[%s1611_s3] sm:$0xff]  ;;  %v614_v45 = vld [vmem:[%s1611_s3 + $0x8] sm:$0xff]  ;;  %v615_v49 = vld [vmem:[%s1611_s3 + $0x10] sm:$0xff]  ;;  %s735_s12 = scalar_lea.sflag [#allocation7], %s1502_s26  ;;  %s1304_s16 = smov [#allocation6]  }
  0x40   : > { %1064 = vmatprep.subr.bf16.mxu0 %v1063_v21  ;;  %v499_v36 = vrot.slane %v1434_v25, 1  ;;  %v605_v46 = vrot.slane %v1434_v25, 2  ;;  %v604_v47 = vrot.slane %v299_v24, 2  ;;  %v616_v50 = vld [vmem:[%s1611_s3 + $0x18] sm:$0xff]  ;;  %v1087_v53 = vpack.c.bf16 %v614_v45, %v613_v44  ;;  %v511_v55 = vld [vmem:[#allocation2 + $0xa8] sm:$0xff]  ;;  %v618_v62 = vld [vmem:[%s1611_s3 + $0x28] sm:$0xff]  ;;  %p1202_p10 = pnand %p1201_p6, %p1625_p9 }
  0x41   : > { %v331_v31 = vrot.slane %v302_v27, 1  ;;  %v332_v33 = vrot.slane %v1439_v29, 1  ;;  %994 = vmatprep.mubr.msk.f32.mxu0 %vm336_vm0, %v302_v27  ;;  %v334_v39 = vrot.slane %v1443_v34, 1  ;;  %v518_v51 = vrot.slane %v302_v27, 2  ;;  %v510_v54 = vld [vmem:[#allocation2 + $0xa0] sm:$0xff]  ;;  %v617_v61 = vld [vmem:[%s1611_s3 + $0x20] sm:$0xff] }
  0x42   : > { %1050 = vmatpush3.bf16.msra.mxu1 %v1047_v17  ;;  %v500_v43 = vsel %vm330_vm1, %v498_v35, %v499_v36  ;;  %v519_v56 = vrot.slane %v1439_v29, 2  ;;  %v606_v58 = vsel %vm517_vm2, %v604_v47, %v605_v46  ;;  %v1091_v59 = vpack.c.bf16 %v616_v50, %v615_v49  ;;  %v512_v63 = vld [vmem:[#allocation2 + $0xb0] sm:$0xff]  ;;  %v513_v0 = vld [vmem:[#allocation2 + $0xb8] sm:$0xff]  ;;  %v620_v7 = vld [vmem:[%s1611_s3 + $0x38] sm:$0xff]  ;;  %p1203_p12 = pneg %p1202_p10  ;;  %s1204_s17 = sshll.u32 %s1304_s16, 4  ;;  %s1205_s17 = int_to_ptr.vmem [resolvable:$false] %s1204_s17 }
  0x43   : > { %v333_v37 = vsel %vm330_vm1, %v331_v31, %v332_v33  ;;  %1066 = vmatpush3.bf16.msra.mxu0 %v1063_v21  ;;  %1052 = vmatprep.subr.bf16.mxu1 %v1051_v30  ;;  %v335_v52 = vsel %vm330_vm1, %v332_v33, %v334_v39  ;;  %v505_v57 = vadd.f32 %v500_v43, %v299_v24  ;;  %v619_v6 = vld [vmem:[%s1611_s3 + $0x30] sm:$0xff]  ;;  %v514_v8 = vld [vmem:[#allocation2 + $0xc0] sm:$0xff]  ;;  %v515_v9 = vld [vmem:[#allocation2 + $0xc8] sm:$0xff]  ;;  %v521_v18 = vrot.slane %v1443_v34, 2  ;;  %s1206_s18 = scalar_lea.vmem %s1205_s17, 512  ;;  %p1207_p2 = scmp.lt.s32.totalorder %s1508_s10, %s1205_s17 }
  0x44   : > { %1068 = vmatprep.subr.bf16.mxu0 %v1067_v32  ;;  %973 = vmatprep.mubr.msk.f32.mxu1 %vm336_vm0, %v333_v37  ;;  %v1075_v60 = vpack.c.bf16 %v511_v55, %v510_v54  ;;  %v520_v1 = vsel %vm517_vm2, %v518_v51, %v519_v56  ;;  %v1095_v3 = vpack.c.bf16 %v618_v62, %v617_v61  ;;  %v621_v15 = vld [vmem:[%s1611_s3 + $0x40] sm:$0xff]  ;;  %v516_v17 = vld [vmem:[#allocation2 + $0xd0] sm:$0xff]  ;;  %p1208_p3 = scmp.lt.s32.totalorder %s1206_s18, %s1200_s15 }
  0x45   : > { %v611_v2 = vadd.f32 %v606_v58, %v505_v57  ;;  %v1079_v5 = vpack.c.bf16 %v513_v0, %v512_v63  ;;  %v1099_v10 = vpack.c.bf16 %v620_v7, %v619_v6  ;;  %v502_v11 = vsel %vm330_vm1, %v499_v36, %v501_v4 }
  0x46   : > { %1054 = vmatpush3.bf16.msra.mxu1 %v1051_v30  ;;  %v1083_v12 = vpack.c.bf16 %v515_v9, %v514_v8  ;;  %v506_v14 = vadd.f32 %v502_v11, %v1434_v25  ;;  %v608_v16 = vsel %vm517_vm2, %v605_v46, %v607_v13  ;;  %v522_v20 = vsel %vm517_vm2, %v519_v56, %v521_v18  ;;  %p1209_p4 = por %p1208_p3, %p1207_p2 }
  0x47   : > { %1070 = vmatpush3.bf16.msra.mxu0 %v1067_v32  ;;  %971 = vmatprep.subr.mxu1 %v326_v38 }
  0x48   : > { %992 = vmatprep.subr.mxu0 %v314_v42  ;;  %v612_v19 = vadd.f32 %v608_v16, %v506_v14  ;;  %p1210_p7 = pnand %p1209_p4, %p1203_p12 }
  0x4a   : > { %972 = vmatpush3.msra.mxu1 %v326_v38 }
  0x4b   : > { %993 = vmatpush3.msra.mxu0 %v314_v42  ;;  %974 = vmatmul.mubr.msk.f32.vlgmr.msra.gmra.mrb[0].mxu1 %vm336_vm0, %v335_v52 }
  0x4c   : > { %1072 = vmatprep.subr.bf16.mxu0 %v1071_v48  ;;  %1088 = vmatprep.subr.bf16.mxu1 %v1087_v53 }
  0x4d   : > { %995 = vmatmul.mubr.msk.f32.vlgmr.msra.gmra.mrb[0].mxu0 %vm336_vm0, %v1439_v29  ;;  %1090 = vmatpush3.bf16.msra.mxu1 %v1087_v53  ;;  %v1303_v29 = vmov 1.0  }
  0x4e   : > { %1074 = vmatpush3.bf16.msra.mxu0 %v1071_v48  ;;  %1092 = vmatprep.subr.bf16.mxu1 %v1091_v59 }
  0x4f   : > { %1076 = vmatprep.subr.bf16.mxu0 %v1075_v60  ;;  %1015 = vmatprep.mubr.msk.f32.mxu0 %vm336_vm0, %v520_v1 }
  0x50   : > { %1036 = vmatprep.mubr.msk.f32.mxu1 %vm336_vm0, %v611_v2 }
  0x51   : > { %1094 = vmatpush3.bf16.msra.mxu1 %v1091_v59 }
  0x52   : > { %1078 = vmatpush3.bf16.msra.mxu0 %v1075_v60  ;;  %1096 = vmatprep.subr.bf16.mxu1 %v1095_v3 }
  0x53   : > { %1080 = vmatprep.subr.bf16.mxu0 %v1079_v5 }
  0x55   : > { %1098 = vmatpush3.bf16.msra.mxu1 %v1095_v3 }
  0x56   : > { %1082 = vmatpush3.bf16.msra.mxu0 %v1079_v5  ;;  %1100 = vmatprep.subr.bf16.mxu1 %v1099_v10 }
  0x57   : > { %1084 = vmatprep.subr.bf16.mxu0 %v1083_v12 }
  0x59   : > { %1102 = vmatpush3.bf16.msra.mxu1 %v1099_v10 }
  0x5a   : > { %1086 = vmatpush3.bf16.msra.mxu0 %v1083_v12  ;;  %1034 = vmatprep.subr.mxu1 %v621_v15 }
  0x5b   : > { %1013 = vmatprep.subr.mxu0 %v516_v17 }
  0x5d   : > { %1035 = vmatpush3.msra.mxu1 %v621_v15 }
  0x5e   : > { %1014 = vmatpush3.msra.mxu0 %v516_v17  ;;  %1037 = vmatmul.mubr.msk.f32.vlgmr.msra.gmra.mrb[2].mxu1 %vm336_vm0, %v612_v19 }
  0x5f   : > { %1016 = vmatmul.mubr.msk.f32.vlgmr.msra.gmra.mrb[0].mxu0 %vm336_vm0, %v522_v20 }
 0x11e   : > { %v975_v21 = vpop.f32.mrb[0].mxu1 }
 0x11f   : > { %v407_v22 = vpop.f32.mrb[1].mxu1 }
 0x131   : > { %v1038_v23 = vpop.f32.mrb[2].mxu1 }
 0x132   : > { %v1017_v24 = vpop.f32.mrb[0].mxu0  ;;  %vm704_vm3 = vcmp.eq.f32.partialorder %v1038_v23, 0.0  ;;  %v694_v25 = vpop.f32.mrb[3].mxu1 }
 0x133   : > { %v1103_v26 = vadd.f32 %v1017_v24, %v975_v21  ;;  %v706_v27 = vsel %vm704_vm3, 1.0, %v1038_v23  ;;  %v593_v28 = vpop.f32.mrb[1].mxu0  ;;  %vm703_vm4 = vcmp.eq.f32.partialorder %v694_v25, 0.0  ;;  %v724_v30 = vsel %vm704_vm3, 0.0, %v1303_v29 }
 0x134   : > { %1168 = vrcp.f32 %v706_v27  ;;  %v1104_v31 = vadd.f32 %v593_v28, %v407_v22  ;;  %v705_v32 = vsel %vm703_vm4, 1.0, %v694_v25  ;;  %v723_v33 = vsel %vm703_vm4, 0.0, %v1303_v29  ;;  %728 = vst [vmem:[%s285_s29 + $0x8] sm:$0xff] %v724_v30 }
 0x135   : > { %1170 = vrcp.f32 %v705_v32  ;;  %727 = vst [vmem:[%s285_s29] sm:$0xff] %v723_v33 }
 0x136   : > { %1213 = shalt.err (!%p1210_p7)
}
 0x137   : > { %s1214_s19 = scalar_lea.hbm %s1517_s11, 256  ;;  %s1218_s14 = scalar_lea.hbm %s1614_s6, 512 }
 0x138   : > { %p1215_p8 = scmp.ne.s32.totalorder %s1517_s11, %s1214_s19  ;;  %p1219_p1 = scmp.lt.u32.totalorder %s1517_s11, %s1614_s6 }
 0x139   : > { %p1220_p0 = scmp.lt.u32.totalorder %s1218_s14, %s1214_s19  ;;  %p1222_p6 = scmp.lt.u32.totalorder %s1214_s19, %s1517_s11 }
 0x13a   : > { %p1216_p11 = pnand %p1215_p8, %p1625_p9 }
 0x13b   : > { %p1221_p5 = por %p1220_p0, %p1219_p1 }
 0x13c   : > { %p1217_p13 = pneg %p1216_p11 }
 0x13d   : > { %p1223_p10 = por %p1222_p6, %p1221_p5 }
 0x13f   : > { %p1224_p12 = pnand %p1223_p10, %p1217_p13 }
 0x141   : > { %1227 = shalt.err (!%p1224_p12)
}
 0x142   : > { %s1305_s15 = smov 128   ;;  %s1306_s17 = smov 8   ;;  %v1169_v34 = vpop.eup %1168  ;;  %v900_v35 = vld [vmem:[%s1612_s4] ss:$0 sm:$0xff] }
 0x143   : > { %1113 = dma.vmem_to_hbm [thread:$0]  (%p1625_p9), %s1508_s10, 256, %s1517_s11, %s735_s12, %s1305_s15, %s1305_s15, %s1306_s17   ;;  %v1171_v36 = vpop.eup %1170  ;;  %v710_v37 = vmul.f32 %v1169_v34, %v1103_v26 }
 0x144   : > { %v709_v38 = vmul.f32 %v1171_v36, %v1104_v31  ;;  %s278_s20 = scalar_lea.vmem [#allocation5], %s888_s28  ;;  %s1562_s12 = scalar_lea.hbm %s1613_s5, %s909_s13 }
 0x145   : > { %v718_v39 = vadd.f32 %v900_v35, %v710_v37  ;;  %s748_s29 = sshll.u32 %s278_s20, 4  ;;  %s730_s28 = scalar_lea.sflag [#allocation4], %s1502_s26  ;;  %s1555_s29 = int_to_ptr.vmem [resolvable:$true] %s748_s29 }
 0x146   : > { %v717_v40 = vadd.f32 %v900_v35, %v709_v38  ;;  %s1228_s14 = scalar_lea.vmem %s1555_s29, 256  ;;  %s1307_s9 = smov [#allocation5]  }
 0x147   : > { %v720_v41 = vsel %vm704_vm3, 0.0, %v718_v39  ;;  %p1229_p2 = scmp.ne.s32.totalorder %s1555_s29, %s1228_s14  ;;  %s1232_s16 = sshll.u32 %s1307_s9, 4  ;;  %s1233_s16 = int_to_ptr.vmem [resolvable:$false] %s1232_s16 }
 0x148   : > { %v722_v42 = vmax.f32 %v720_v41, 0.0  ;;  %v719_v43 = vsel %vm703_vm4, 0.0, %v717_v40  ;;  %s1234_s25 = scalar_lea.vmem %s1233_s16, 512  ;;  %p1235_p7 = scmp.lt.s32.totalorder %s1555_s29, %s1233_s16 }
 0x149   : > { %v721_v44 = vmax.f32 %v719_v43, 0.0  ;;  %p1230_p3 = pnand %p1229_p2, %p1625_p9  ;;  %p1236_p8 = scmp.lt.s32.totalorder %s1234_s25, %s1228_s14 }
 0x14a   : > { %726 = vst [vmem:[%s278_s20 + $0x8] sm:$0xff] %v722_v42 }
 0x14b   : > { %725 = vst [vmem:[%s278_s20] sm:$0xff] %v721_v44  ;;  %p1231_p4 = pneg %p1230_p3  ;;  %p1237_p11 = por %p1236_p8, %p1235_p7 }
 0x14d   : > { %p1238_p13 = pnand %p1237_p11, %p1231_p4 }
 0x14f   : > { %1241 = shalt.err (!%p1238_p13)
}
 0x150   : > { %s1242_s13 = scalar_lea.hbm %s1562_s12, 256  ;;  %s1246_s20 = scalar_lea.hbm %s1613_s5, 512 }
 0x151   : > { %p1243_p1 = scmp.ne.s32.totalorder %s1562_s12, %s1242_s13  ;;  %p1247_p6 = scmp.lt.u32.totalorder %s1562_s12, %s1613_s5 }
 0x152   : > { %p1248_p10 = scmp.lt.u32.totalorder %s1246_s20, %s1242_s13  ;;  %p1250_p2 = scmp.lt.u32.totalorder %s1242_s13, %s1562_s12 }
 0x153   : > { %p1244_p0 = pnand %p1243_p1, %p1625_p9 }
 0x154   : > { %p1249_p12 = por %p1248_p10, %p1247_p6 }
 0x155   : > { %p1245_p5 = pneg %p1244_p0 }
 0x156   : > { %p1251_p3 = por %p1250_p2, %p1249_p12 }
 0x158   : > { %p1252_p4 = pnand %p1251_p3, %p1245_p5 }
 0x15a   : > { %1255 = shalt.err (!%p1252_p4)
}
 0x15b   : > { %1112 = dma.vmem_to_hbm [thread:$0]  (%p1625_p9), %s1555_s29, 256, %s1562_s12, %s730_s28, %s1305_s15, %s1305_s15, %s1306_s17  }
 0x15c PF: > { %p1129_p7 = scmp.ge.s32.totalorder %s1298_s24, 2  ;;  %s779_s14 = sand.u32 1, %s1286_s21  }
 0x15d   : > { %p1626_p8 = scmp.ne.s32.totalorder %s1619_s8, 0  ;;  %s780_s9 = scalar_lea.sflag [#allocation4], %s779_s14 }
 0x15f   : > { %p1121_p11 = pnand %p1129_p7, %p1626_p8 }
 0x161   : > { %1277 = dma.done.wait (!%p1121_p11), %s780_s9, 256  }
 0x162   : > { %1279 = vsyncadd (!%p1121_p11), %s780_s9, 4294967040  ;;  %s789_s7 = scalar_lea.sflag [#allocation7], %s779_s14 }
 0x163   : > { %1281 = dma.done.wait (!%p1121_p11), %s789_s7, 256  }
 0x164   : > { %1283 = vsyncadd (!%p1121_p11), %s789_s7, 4294967040  ;;  %p21_p9 = scmp.ge.s32.totalorder %s1368_s27, 4   ;;  %s1627_s21 = smov %s1290_s22 }
 0x165   : > { %s1628_s22 = smov %s1294_s23  ;;  %s1629_s23 = smov %s1379_s30 }
 0x166   : > { %s1630_s24 = smov %s1368_s27  ;;  %23 = sbr.rel (!%p21_p9) target bundleno = 6 (0x6), region = 102 }
 0x16d   :  { %794 = vsyncpa [#allocation3], 1 }
 0x16e   :  { %796 = vsyncpa [#allocation3 + $0x1], 1 }
 0x16f   :  { %797 = vsyncpa [#allocation4], 1 }
 0x170   :  { %799 = vsyncpa [#allocation4 + $0x1], 1 }
 0x171   :  { %800 = vsyncpa [#allocation7], 1 }
 0x172   :  { %802 = vsyncpa [#allocation7 + $0x1], 1 }

</bundles_post_ra>
